<compile_context>
chip_gen: v5e
topology: v5e:2x2
jax: 0.10.0
libtpu: 0.0.40
codegen_flags: <defaults>
</compile_context>

<pallas_src>
import jax
import jax.numpy as jnp
from jax.experimental import pallas as pl
from jax.experimental.pallas import tpu as pltpu

# ---- MLN / head configuration (synthetic, deterministic) --------------------
NUM_CLASSES = 10           # K object categories
Y_DIM = NUM_CLASSES + 1    # K+1 (with background)
K_MIX = 5                  # number of mixture components in MixtureOfLogits
BOX_DIM = 4
NUM_BBOX_REG_CLASSES = NUM_CLASSES   # class-specific box regression
SIG_MIN = 1.0
SIG_MAX = 10.0
# TODO(synk): exact sig_min/sig_max/SHARE_SIG come from cfg; using the common
#             MLN defaults (shared sigma, sigmoid-squashed range [1, 10]).

# Fused output column layout: [pi | mu | sigma | box | pad] -> 128 lanes.
PI_OFF = 0
MU_W = K_MIX * Y_DIM                       # 55
MU_OFF = PI_OFF + K_MIX                    # 5
SIG_OFF = MU_OFF + MU_W                    # 60
BOX_W = NUM_BBOX_REG_CLASSES * BOX_DIM     # 40
BOX_OFF = SIG_OFF + K_MIX                  # 65
TOTAL_W = BOX_OFF + BOX_W                  # 105
OUT_W = 128                                # lane-dense padded width

TILE_N_MAX = 512                           # review item 2: big row tiles
X_STREAM_VMEM_BUDGET = 24 * 1024 * 1024    # v7x-safe (64 MiB VMEM) budget for streamed tiles


def _round_up(v, m):
    return ((v + m - 1) // m) * m


def _choose_tile_n(n, d):
    """Row tile: as large as possible (fewer grid steps) within a v7x-safe VMEM budget.

    Single tile covering all rows (rounded to 16 sublanes for bf16) when N is small.
    For very large D the cap shrinks the tile instead of K-tiling D (weight is only
    D*128*2B, so it stays resident without a K loop even at D = 256*7*7).
    """
    per_row = 2 * d * 2 + 2 * OUT_W * 4    # double-buffered bf16 x row + f32 out row
    cap = max(16, X_STREAM_VMEM_BUDGET // per_row)
    tile = min(TILE_N_MAX, cap, _round_up(n, 16))
    return max(16, (tile // 16) * 16)


def _vmem_limit(tile_n, d):
    need = (2 * tile_n * d * 2          # double-buffered bf16 x tiles
            + d * OUT_W * 2             # resident bf16 fused weight
            + OUT_W * 4                 # resident f32 fused bias
            + 2 * tile_n * OUT_W * 4)   # double-buffered f32 output tiles
    return int(min(64 * 1024 * 1024, max(8 * 1024 * 1024, 2 * need)))


def _mln_fused_kernel(x_ref, w_ref, b_ref, out_ref):
    """One row tile: single fused bf16 matmul (f32 acc) + in-lane softmax / bounded sigmoid."""
    z = jnp.dot(x_ref[...], w_ref[...],
                preferred_element_type=jnp.float32) + b_ref[...]   # (TILE_N, 128) f32

    col = jax.lax.broadcasted_iota(jnp.int32, z.shape, 1)
    pi_mask = col < K_MIX
    sig_mask = (col >= SIG_OFF) & (col < SIG_OFF + K_MIX)

    # --- pi head: masked (lane-dense) softmax over the K_MIX pi columns ---
    z_pi = jnp.where(pi_mask, z, -jnp.inf)
    m = jnp.max(z_pi, axis=-1, keepdims=True)
    e = jnp.exp(z_pi - m)                             # masked cols -> exp(-inf) = 0
    s = jnp.sum(e, axis=-1, keepdims=True)
    pi_vals = e * pl.reciprocal(s, approx=True)       # EUP vrcp, free bundle slot

    # --- sigma head: bounded sigmoid squash (full-width on the EUP) ---
    sig_vals = SIG_MIN + (SIG_MAX - SIG_MIN) * jax.nn.sigmoid(4.0 * z)

    # mu / box columns pass through untouched; single lane-dense store.
    out_ref[...] = jnp.where(pi_mask, pi_vals, jnp.where(sig_mask, sig_vals, z))


def pack_params(params):
    """Concatenate the four head weights/biases along the output dim, pad to 128 lanes.

    Weight is stored bf16 (streamed/resident operand of the bf16 MXU matmul);
    bias stays f32 (added to the f32 accumulator).
    """
    w = jnp.concatenate(
        [params["w_pi"], params["w_mu"], params["w_sigma"], params["w_box"]], axis=1)
    b = jnp.concatenate(
        [params["b_pi"], params["b_mu"], params["b_sigma"], params["b_box"]], axis=1)
    pad = OUT_W - w.shape[1]
    w = jnp.pad(w, ((0, 0), (0, pad)))
    b = jnp.pad(b, ((0, 0), (0, pad)))
    return w.astype(jnp.bfloat16), b.astype(jnp.float32)


@jax.jit
def fast_rcnn_mln_forward(x, w_fused, b_fused):
    """x: (N, C, H, W) float32 -> (scores_dict, proposal_deltas)."""
    n = x.shape[0]
    x2d = x.reshape(n, -1)  # row-major flatten == torch.flatten(start_dim=1)
    d = x2d.shape[1]

    tile_n = _choose_tile_n(n, d)          # static (shapes are static under jit)
    grid = (pl.cdiv(n, tile_n),)           # ragged last block handled by Pallas

    x_bf = x2d.astype(jnp.bfloat16)        # halve HBM traffic on the dominant stream

    fused = pl.pallas_call(
        _mln_fused_kernel,
        out_shape=jax.ShapeDtypeStruct((n, OUT_W), jnp.float32),
        grid_spec=pltpu.PrefetchScalarGridSpec(
            num_scalar_prefetch=0,
            grid=grid,
            in_specs=[
                pl.BlockSpec((tile_n, d), lambda i: (i, 0)),        # x row tile (pipelined)
                pl.BlockSpec(memory_space=pltpu.MemorySpace.VMEM),  # fused weight, resident (single buffer)
                pl.BlockSpec(memory_space=pltpu.MemorySpace.VMEM),  # fused bias, resident
            ],
            out_specs=pl.BlockSpec((tile_n, OUT_W), lambda i: (i, 0)),
        ),
        compiler_params=pltpu.CompilerParams(
            dimension_semantics=("parallel",),   # shards row tiles across v7x's 2 TCs
            vmem_limit_bytes=_vmem_limit(tile_n, d),
        ),
        cost_estimate=pl.CostEstimate(
            flops=2 * n * d * OUT_W,
            transcendentals=2 * n * OUT_W,
            bytes_accessed=2 * n * d + 2 * d * OUT_W + 4 * OUT_W + 4 * n * OUT_W,
        ),
    )(x_bf, w_fused, b_fused)

    pi = fused[:, PI_OFF:PI_OFF + K_MIX]
    mu = fused[:, MU_OFF:MU_OFF + MU_W].reshape(n, K_MIX, Y_DIM)
    # shared sigma: squash already applied in-kernel; it commutes with the
    # broadcast, matching the torch expand-then-squash order.
    sigma = jnp.broadcast_to(fused[:, SIG_OFF:SIG_OFF + K_MIX][:, :, None],
                             (n, K_MIX, Y_DIM))
    deltas = fused[:, BOX_OFF:BOX_OFF + BOX_W]

    scores = {"pi": pi, "mu": mu, "sigma": sigma}
    return scores, deltas


def init_params(key, input_size):
    """Deterministic synthetic parameter init (shapes from the module __init__)."""
    ks = jax.random.split(key, 6)
    params = {
        # MixtureOfLogits.init_parameters(): small normal init, zero bias
        "w_pi": 0.01 * jax.random.normal(ks[0], (input_size, K_MIX), jnp.float32),
        "b_pi": jnp.zeros((1, K_MIX), jnp.float32),
        "w_mu": 0.01 * jax.random.normal(ks[1], (input_size, MU_W), jnp.float32),
        "b_mu": jnp.zeros((1, MU_W), jnp.float32),
        "w_sigma": 0.01 * jax.random.normal(ks[2], (input_size, K_MIX), jnp.float32),
        "b_sigma": jnp.zeros((1, K_MIX), jnp.float32),
        # nn.init.normal_(bbox_pred.weight, std=0.001); bias = 0
        "w_box": 0.001 * jax.random.normal(ks[3], (input_size, BOX_W), jnp.float32),
        "b_box": jnp.zeros((1, BOX_W), jnp.float32),
    }
    return params


def _reference(x, params):
    """Pure-JAX f32 reference (matches the torch module) for correctness check."""
    n = x.shape[0]
    x2d = x.reshape(n, -1)
    pi = jax.nn.softmax(x2d @ params["w_pi"] + params["b_pi"], axis=1)
    mu = (x2d @ params["w_mu"] + params["b_mu"]).reshape(n, K_MIX, Y_DIM)
    sig = x2d @ params["w_sigma"] + params["b_sigma"]
    sig = SIG_MIN + (SIG_MAX - SIG_MIN) * jax.nn.sigmoid(sig * 4.0)
    sigma = jnp.broadcast_to(sig[:, :, None], (n, K_MIX, Y_DIM))
    deltas = x2d @ params["w_box"] + params["b_box"]
    return {"pi": pi, "mu": mu, "sigma": sigma}, deltas


if __name__ == "__main__":
    key = jax.random.PRNGKey(0)
    kx, kp, kx2 = jax.random.split(key, 3)

    C, H, W = 4, 8, 8                       # per-region pooled features (NCHW), D = 256
    params = init_params(kp, C * H * W)
    w_fused, b_fused = pack_params(params)

    def check(n, kin):
        x = jax.random.normal(kin, (n, C, H, W), jnp.float32)
        scores, deltas = fast_rcnn_mln_forward(x, w_fused, b_fused)
        jax.block_until_ready(deltas)
        ref_scores, ref_deltas = _reference(x, params)
        assert scores["pi"].shape == (n, K_MIX)
        assert scores["mu"].shape == (n, K_MIX, Y_DIM)
        assert scores["sigma"].shape == (n, K_MIX, Y_DIM)
        assert deltas.shape == (n, NUM_BBOX_REG_CLASSES * BOX_DIM)
        # bf16 matmul inputs + approx reciprocal -> loosened tolerance (per review).
        for a, b in [(scores["pi"], ref_scores["pi"]),
                     (scores["mu"], ref_scores["mu"]),
                     (scores["sigma"], ref_scores["sigma"]),
                     (deltas, ref_deltas)]:
            assert jnp.allclose(a, b, atol=2e-2, rtol=2e-2), "mismatch vs reference"

    check(16, kx)     # small N: single tile, grid of 1, no padded rows computed
    check(600, kx2)   # multi-step grid + ragged last block (masked partial output store)
    print("KERNEL_OK")
</pallas_src>

<mosaic_0001>
module attributes {stable_mosaic.version = 11 : i64} {
  func.func @_mln_fused_kernel(%arg0: i32, %arg1: memref<16x256xbf16, #tpu.memory_space<vmem>>, %arg2: memref<256x128xbf16, #tpu.memory_space<vmem>>, %arg3: memref<1x128xf32, #tpu.memory_space<vmem>>, %arg4: memref<16x128xf32, #tpu.memory_space<vmem>>) attributes {dimension_semantics = [#tpu.dimension_semantics<parallel>], iteration_bounds = array<i64: 1>, scalar_prefetch = 0 : i64, scratch_operands = 0 : i64, tpu.core_type = #tpu.core_type<tc>, window_params = [{transform_indices = @transform_0, window_bounds = array<i64: 16, 256>}, {pipeline_mode = #tpu.pipeline_mode<synchronous>, transform_indices = @transform_1, window_bounds = array<i64: 256, 128>}, {pipeline_mode = #tpu.pipeline_mode<synchronous>, transform_indices = @transform_2, window_bounds = array<i64: 1, 128>}, {transform_indices = @transform_3, window_bounds = array<i64: 16, 128>}]} {
    %c0 = arith.constant 0 : index
    %c0_0 = arith.constant 0 : index
    %0 = vector.load %arg1[%c0, %c0_0] : memref<16x256xbf16, #tpu.memory_space<vmem>>, vector<16x256xbf16>
    %c0_1 = arith.constant 0 : index
    %c0_2 = arith.constant 0 : index
    %1 = vector.load %arg2[%c0_1, %c0_2] : memref<256x128xbf16, #tpu.memory_space<vmem>>, vector<256x128xbf16>
    %cst = arith.constant dense<0.000000e+00> : vector<16x128xf32>
    %2 = tpu.matmul %0, %1, %cst {dimension_numbers = #tpu.dot_dimension_numbers<[1], [0], [0], [1], [0, 0, 1, 1], [], []>} : vector<16x256xbf16>, vector<256x128xbf16>, vector<16x128xf32> -> vector<16x128xf32>
    %c0_3 = arith.constant 0 : index
    %c0_4 = arith.constant 0 : index
    %3 = vector.load %arg3[%c0_3, %c0_4] : memref<1x128xf32, #tpu.memory_space<vmem>>, vector<1x128xf32>
    %4 = vector.broadcast %3 : vector<1x128xf32> to vector<16x128xf32>
    %5 = arith.addf %2, %4 : vector<16x128xf32>
    %6 = tpu.iota {dimensions = array<i32: 1>} : vector<16x128xi32>
    %c5_i32 = arith.constant 5 : i32
    %7 = vector.broadcast %c5_i32 : i32 to vector<16x128xi32>
    %8 = arith.cmpi slt, %6, %7 : vector<16x128xi32>
    %c60_i32 = arith.constant 60 : i32
    %9 = vector.broadcast %c60_i32 : i32 to vector<16x128xi32>
    %10 = arith.cmpi sge, %6, %9 : vector<16x128xi32>
    %c65_i32 = arith.constant 65 : i32
    %11 = vector.broadcast %c65_i32 : i32 to vector<16x128xi32>
    %12 = arith.cmpi slt, %6, %11 : vector<16x128xi32>
    %13 = arith.andi %10, %12 : vector<16x128xi1>
    %cst_5 = arith.constant 0xFF800000 : f32
    %14 = vector.broadcast %cst_5 : f32 to vector<16x128xf32>
    %15 = arith.select %8, %5, %14 : vector<16x128xi1>, vector<16x128xf32>
    %cst_6 = arith.constant dense<0xFF800000> : vector<16xf32>
    %16 = vector.multi_reduction <maximumf>, %15, %cst_6 [1] : vector<16x128xf32> to vector<16xf32>
    %17 = vector.shape_cast %16 : vector<16xf32> to vector<16x1xf32>
    %18 = vector.broadcast %17 : vector<16x1xf32> to vector<16x128xf32>
    %19 = arith.subf %15, %18 : vector<16x128xf32>
    %20 = math.exp %19 : vector<16x128xf32>
    %cst_7 = arith.constant dense<0.000000e+00> : vector<16xf32>
    %21 = vector.multi_reduction <add>, %20, %cst_7 [1] : vector<16x128xf32> to vector<16xf32>
    %22 = vector.shape_cast %21 : vector<16xf32> to vector<16x1xf32>
    %23 = tpu.reciprocal %22 {approx = true} : vector<16x1xf32> -> vector<16x1xf32>
    %24 = vector.broadcast %23 : vector<16x1xf32> to vector<16x128xf32>
    %25 = arith.mulf %20, %24 : vector<16x128xf32>
    %cst_8 = arith.constant 4.000000e+00 : f32
    %26 = vector.broadcast %cst_8 : f32 to vector<16x128xf32>
    %27 = arith.mulf %26, %5 : vector<16x128xf32>
    %28 = arith.negf %27 : vector<16x128xf32>
    %29 = math.exp %28 : vector<16x128xf32>
    %cst_9 = arith.constant 1.000000e+00 : f32
    %30 = vector.broadcast %cst_9 : f32 to vector<16x128xf32>
    %31 = arith.addf %30, %29 : vector<16x128xf32>
    %32 = arith.divf %30, %31 : vector<16x128xf32>
    %cst_10 = arith.constant 9.000000e+00 : f32
    %33 = vector.broadcast %cst_10 : f32 to vector<16x128xf32>
    %34 = arith.mulf %33, %32 : vector<16x128xf32>
    %cst_11 = arith.constant 1.000000e+00 : f32
    %35 = vector.broadcast %cst_11 : f32 to vector<16x128xf32>
    %36 = arith.addf %35, %34 : vector<16x128xf32>
    %37 = arith.select %13, %36, %5 : vector<16x128xi1>, vector<16x128xf32>
    %38 = arith.select %8, %25, %37 : vector<16x128xi1>, vector<16x128xf32>
    %c0_12 = arith.constant 0 : index
    %c0_13 = arith.constant 0 : index
    %39 = vector.load %arg4[%c0_12, %c0_13] : memref<16x128xf32, #tpu.memory_space<vmem>>, vector<16x128xf32>
    tpu.vector_store %arg4[%c0_12, %c0_13], %38 {strides = array<i32>} : memref<16x128xf32, #tpu.memory_space<vmem>>, vector<16x128xf32>,
    return
  }
  func.func @transform_0(%arg0: i32) -> (i32, i32) {
    %c0_i32 = arith.constant 0 : i32
    %c0_i32_0 = arith.constant 0 : i32
    return %arg0, %c0_i32 : i32, i32
  }
  func.func @transform_1(%arg0: i32) -> (i32, i32) {
    %c0_i32 = arith.constant 0 : i32
    %c0_i32_0 = arith.constant 0 : i32
    %c0_i32_1 = arith.constant 0 : i32
    return %c0_i32, %c0_i32_0 : i32, i32
  }
  func.func @transform_2(%arg0: i32) -> (i32, i32) {
    %c0_i32 = arith.constant 0 : i32
    %c0_i32_0 = arith.constant 0 : i32
    %c0_i32_1 = arith.constant 0 : i32
    return %c0_i32, %c0_i32_0 : i32, i32
  }
  func.func @transform_3(%arg0: i32) -> (i32, i32) {
    %c0_i32 = arith.constant 0 : i32
    %c0_i32_0 = arith.constant 0 : i32
    return %arg0, %c0_i32 : i32, i32
  }
}

</mosaic_0001>

<bundles_post_ra>
// kernel: fast_rcnn_mln_forward.1
= control target key start
LH: loop header
LB: loop body
LE: loop exit
PB: predicated region body
PF: predicated region fallthrough
CT: control target
= control target key end

     0   :  { %v186_v22 = vlaneseq  ;;  %s495_s1 = inlined_call_operand.vmem [shape: bf16[256,128], index: 1, kind: input, shape index: {}]   ;;  %s496_s2 = inlined_call_operand.vmem [shape: f32[1,128], index: 2, kind: input, shape index: {}]   ;;  %s497_s0 = inlined_call_operand.vmem [shape: bf16[16,256], index: 0, kind: input, shape index: {}]   ;;  %s498_s3 = inlined_call_operand.vmem [shape: f32[16,128], index: 3, kind: output, shape index: {}]  }
   0x1   :  { %v349_v0 = vld [vmem:[%s495_s1 + $0x38] sm:$0xff]  ;;  %v348_v2 = vld [vmem:[%s495_s1 + $0x30] sm:$0xff]  ;;  %v347_v4 = vld [vmem:[%s495_s1 + $0x28] sm:$0xff] }
   0x2   :  { %v357_v1 = vld [vmem:[%s495_s1 + $0x78] sm:$0xff]  ;;  %158 = vmatpush.bf16.msra.mxu0 %v349_v0  ;;  %v356_v3 = vld [vmem:[%s495_s1 + $0x70] sm:$0xff]  ;;  %v355_v5 = vld [vmem:[%s495_s1 + $0x68] sm:$0xff]  ;;  %v458_v24 = vand.u32 127, %v186_v22 }
   0x3   :  { %172 = vmatpush.bf16.msra.mxu1 %v357_v1  ;;  %v346_v6 = vld [vmem:[%s495_s1 + $0x20] sm:$0xff]  ;;  %v345_v8 = vld [vmem:[%s495_s1 + $0x18] sm:$0xff]  ;;  %v344_v10 = vld [vmem:[%s495_s1 + $0x10] sm:$0xff] }
   0x4   :  { %v354_v7 = vld [vmem:[%s495_s1 + $0x60] sm:$0xff]  ;;  %v353_v9 = vld [vmem:[%s495_s1 + $0x58] sm:$0xff]  ;;  %v352_v11 = vld [vmem:[%s495_s1 + $0x50] sm:$0xff]  ;;  %vm188_vm0 = vcmp.lt.s32.totalorder %v458_v24, 5  ;;  %vm189_vm3 = vcmp.ge.s32.totalorder %v458_v24, 60  ;;  %vm190_vm5 = vcmp.lt.s32.totalorder %v458_v24, 65 }
   0x5   :  { %v343_v12 = vld [vmem:[%s495_s1 + $0x8] sm:$0xff]  ;;  %v342_v14 = vld [vmem:[%s495_s1] sm:$0xff]  ;;  %vm475_vm7 = vmand %vm189_vm3, %vm190_vm5 }
   0x6   :  { %159 = vmatpush.bf16.msra.mxu0 %v348_v2  ;;  %v351_v13 = vld [vmem:[%s495_s1 + $0x48] sm:$0xff]  ;;  %v350_v15 = vld [vmem:[%s495_s1 + $0x40] sm:$0xff] }
   0x7   :  { %173 = vmatpush.bf16.msra.mxu1 %v356_v3  ;;  %v268_v16 = vld [vmem:[%s497_s0] sm:$0xf]  ;;  %v341_v17 = vld [vmem:[%s497_s0 + $0x4] sm:$0xf0]  ;;  %v340_v18 = vld [vmem:[%s497_s0 + $0x4] sm:$0xf] }
   0x8   :  { %v270_v19 = vld [vmem:[%s497_s0 + $0x8] sm:$0xf0]  ;;  %v269_v20 = vor.u32 %v341_v17, %v268_v16  ;;  %v358_v23 = vld [vmem:[%s496_s2] ss:$0 sm:$0xff] }
   0x9   :  { %v273_v21 = vor.u32 %v340_v18, %v270_v19 }
   0xa   :  { %160 = vmatpush.bf16.msra.mxu0 %v347_v4 }
   0xb   :  { %174 = vmatpush.bf16.msra.mxu1 %v355_v5 }
   0xe   :  { %161 = vmatpush.bf16.msra.mxu0 %v346_v6 }
   0xf   :  { %175 = vmatpush.bf16.msra.mxu1 %v354_v7 }
  0x12   :  { %162 = vmatpush.bf16.msra.mxu0 %v345_v8 }
  0x13   :  { %176 = vmatpush.bf16.msra.mxu1 %v353_v9 }
  0x16   :  { %163 = vmatpush.bf16.msra.mxu0 %v344_v10 }
  0x17   :  { %177 = vmatpush.bf16.msra.mxu1 %v352_v11 }
  0x1a   :  { %164 = vmatpush.bf16.msra.mxu0 %v343_v12 }
  0x1b   :  { %178 = vmatpush.bf16.msra.mxu1 %v351_v13 }
  0x1e   :  { %165 = vmatpush.bf16.msra.mxu0 %v342_v14 }
  0x1f   :  { %179 = vmatpush.bf16.msra.mxu1 %v350_v15 }
  0x21   :  { %166 = vmatmul.bf16.vlgmr.msra.gmra.mxu0 %v269_v20 }
  0x22   :  { %180 = vmatmul.bf16.vlgmr.msra.gmra.mxu1 %v273_v21 }
  0x9e   :  { %v167_v25 = vpop.f32.mrf.mxu0 }
  0x9f   :  { %v181_v26 = vpop.f32.mrf.mxu1  ;;  %v168_v27 = vadd.f32 %v358_v23, %v167_v25 }
  0xa1   :  { %v461_v28 = vadd.f32 %v181_v26, %v168_v27 }
  0xa3   :  { %v338_v29 = vmul.f32 -4.0, %v461_v28  ;;  %v192_v30 = vsel %vm188_vm0, %v461_v28, -inf }
  0xa4   :  { %194 = vmax.xlane.f32.xlu0 %v192_v30 }
  0xa5   :  { %v216_v31 = vmul.f32 1.442695, %v338_v29 }
  0xa6   :  { %v169_v32 = vpop.f32.mrf.mxu0 }
  0xa7   :  { %359 = vpow2.f32 %v216_v31  ;;  %v170_v33 = vadd.f32 %v358_v23, %v169_v32  ;;  %v183_v34 = vpop.f32.mrf.mxu1 }
  0xa9   :  { %v467_v35 = vadd.f32 %v183_v34, %v170_v33 }
  0xab   :  { %v339_v36 = vmul.f32 -4.0, %v467_v35  ;;  %v193_v37 = vsel %vm188_vm0, %v467_v35, -inf }
  0xac   :  { %196 = vmax.xlane.f32.xlu0 %v193_v37 }
  0xad   :  { %v360_v38 = vpop.eup %359  ;;  %v218_v39 = vmul.f32 1.442695, %v339_v36 }
  0xae   :  { %v220_v40 = vadd.f32 1.0, %v360_v38 }
  0xaf   :  { %361 = vpow2.f32 %v218_v39 }
  0xb0   :  { %363 = vrcp.f32 %v220_v40  ;;  %v233_v46 = vand.u32 2147483648, %v220_v40  ;;  %v231_v48 = vand.u32 2147483647, %v220_v40  ;;  %vm227_vm2 = vweird.f32 %v220_v40 }
  0xb2   :  { %v234_v51 = vor.u32 1.1754944e-38, %v233_v46  ;;  %vm232_vm6 = vcmp.eq.f32.partialorder %v231_v48, 8.507059e+37 }
  0xb5   :  { %v362_v41 = vpop.eup %361 }
  0xb6   :  { %v364_v42 = vpop.eup %363  ;;  %v221_v43 = vadd.f32 1.0, %v362_v41 }
  0xb7   :  { %v223_v44 = vmul.f32 %v364_v42, %v220_v40  ;;  %vm228_vm1 = vweird.f32 %v364_v42 }
  0xb8   :  { %365 = vrcp.f32 %v221_v43  ;;  %vm229_vm4 = vmor %vm227_vm2, %vm228_vm1  ;;  %v248_v58 = vand.u32 2147483648, %v221_v43  ;;  %v246_v61 = vand.u32 2147483647, %v221_v43  ;;  %vm242_vm9 = vweird.f32 %v221_v43 }
  0xb9   :  { %v224_v45 = vsub.f32 1.0, %v223_v44 }
  0xba   :  { %v249_v0 = vor.u32 1.1754944e-38, %v248_v58  ;;  %vm247_vm11 = vcmp.eq.f32.partialorder %v246_v61, 8.507059e+37 }
  0xbb   :  { %v225_v47 = vmul.f32 %v364_v42, %v224_v45 }
  0xbd   :  { %v226_v49 = vadd.f32 %v364_v42, %v225_v47 }
  0xbe   :  { %v366_v50 = vpop.eup %365 }
  0xbf   :  { %v230_v52 = vsel %vm229_vm4, %v364_v42, %v226_v49  ;;  %v238_v53 = vmul.f32 %v366_v50, %v221_v43  ;;  %vm243_vm8 = vweird.f32 %v366_v50 }
  0xc0   :  { %v235_v54 = vsel %vm232_vm6, %v234_v51, %v230_v52  ;;  %vm244_vm10 = vmor %vm242_vm9, %vm243_vm8 }
  0xc1   :  { %v252_v55 = vmul.f32 9.0, %v235_v54  ;;  %v239_v56 = vsub.f32 1.0, %v238_v53 }
  0xc3   :  { %v254_v59 = vadd.f32 1.0, %v252_v55  ;;  %v240_v60 = vmul.f32 %v366_v50, %v239_v56 }
  0xc5   :  { %v256_v62 = vsel %vm475_vm7, %v254_v59, %v461_v28  ;;  %v241_v63 = vadd.f32 %v366_v50, %v240_v60 }
  0xc7   :  { %v245_v1 = vsel %vm244_vm10, %v366_v50, %v241_v63 }
  0xc8   :  { %v250_v2 = vsel %vm247_vm11, %v249_v0, %v245_v1 }
  0xc9   :  { %v253_v3 = vmul.f32 9.0, %v250_v2 }
  0xcb   :  { %v255_v4 = vadd.f32 1.0, %v253_v3 }
  0xcd   :  { %v257_v5 = vsel %vm475_vm7, %v255_v4, %v467_v35 }
 0x117   :  { %v195_v6 = vpop.xlane.xlu0 %194 }
 0x118   :  { %v198_v7 = vsub.f32 %v192_v30, %v195_v6 }
 0x11a   :  { %v200_v8 = vmul.f32 1.442695, %v198_v7 }
 0x11c   :  { %367 = vpow2.f32 %v200_v8 }
 0x11f   :  { %v197_v9 = vpop.xlane.xlu0 %196 }
 0x120   :  { %v199_v10 = vsub.f32 %v193_v37, %v197_v9 }
 0x122   :  { %v368_v11 = vpop.eup %367  ;;  %v202_v12 = vmul.f32 1.442695, %v199_v10 }
 0x123   :  { %204 = vadd.xlane.f32.xlu1 %v368_v11 }
 0x124   :  { %369 = vpow2.f32 %v202_v12 }
 0x12a   :  { %v370_v13 = vpop.eup %369 }
 0x12b   :  { %206 = vadd.xlane.f32.xlu1 %v370_v13 }
 0x196   :  { %v205_v14 = vpop.xlane.xlu1 %204 }
 0x197   :  { %371 = vrcp.f32 %v205_v14 }
 0x19d   :  { %v372_v15 = vpop.eup %371 }
 0x19e   :  { %v210_v16 = vmul.f32 %v372_v15, %v368_v11  ;;  %v207_v17 = vpop.xlane.xlu1 %206 }
 0x19f   :  { %373 = vrcp.f32 %v207_v17 }
 0x1a0   :  { %v258_v18 = vsel %vm188_vm0, %v210_v16, %v256_v62 }
 0x1a1   :  { %260 = vst [vmem:[%s498_s3] sm:$0xff] %v258_v18 }
 0x1a5   :  { %v374_v19 = vpop.eup %373 }
 0x1a6   :  { %v211_v20 = vmul.f32 %v374_v19, %v370_v13 }
 0x1a8   :  { %v259_v21 = vsel %vm188_vm0, %v211_v20, %v257_v5 }
 0x1a9   :  { %261 = vst [vmem:[%s498_s3 + $0x8] sm:$0xff] %v259_v21 }

</bundles_post_ra>
